<compile_context>
chip_gen: v7x
topology: tpu7x:2x2x1
jax: 0.10.0
libtpu: 0.0.40
codegen_flags: <defaults>
</compile_context>

<pallas_src>
import jax
import jax.numpy as jnp
from jax.experimental import pallas as pl
from jax.experimental.pallas import tpu as pltpu


_FALLBACK_VMEM_BYTES = 64 * 1024 * 1024  # conservative: v7x physical VMEM per TC


def _vmem_capacity_bytes():
    try:
        return int(pltpu.get_tpu_info().vmem_capacity_bytes)
    except Exception:
        return _FALLBACK_VMEM_BYTES


def _choose_b_tile(batch, per_batch_bytes):
    """Pick the batch tile from VMEM capacity, keeping >=2 grid steps for megacore."""
    vmem = _vmem_capacity_bytes()
    # ~1/4 of VMEM for the double-buffered x slab; the rest is headroom for the
    # in-kernel f32 temporaries, the (small) output double buffer and compiler scratch.
    budget = vmem // 4
    by_vmem = max(1, budget // (2 * per_batch_bytes))
    by_cores = max(1, -(-batch // 2))        # ceil(B/2): keep the grid length >= 2
    return int(max(1, min(batch, by_vmem, by_cores, 128)))


def _temporal_attention_kernel(x_ref, u1_ref, u2_ref, u3_ref, be_ref, ve_ref, out_ref):
    # x_ref: (B_TILE, T, F, N) with N lane-dense.
    xb = x_ref[...].astype(jnp.float32)
    bt, t, f, n = xb.shape
    u1 = u1_ref[0, :].astype(jnp.float32)      # (N,)
    u2 = u2_ref[...].astype(jnp.float32)       # (F, N)
    u3 = u3_ref[0, :].astype(jnp.float32)      # (F,)
    be = be_ref[...].astype(jnp.float32)       # (T, T)
    ve = ve_ref[...].astype(jnp.float32)       # (T, T)

    # part1a[b, t, f] = sum_n x[b, t, f, n] * U1[n]   (full-lane VPU mul + lane reduce)
    p1a = jnp.sum(xb * u1, axis=-1)                                   # (BT, T, F)
    # part1[b, t, n] = sum_f part1a[b, t, f] * U2[f, n]
    # -> one stacked MXU matmul with M = B_TILE*T rows (no transpose needed).
    part1 = jnp.dot(p1a.reshape(bt * t, f), u2,
                    preferred_element_type=jnp.float32).reshape(bt, t, n)
    # part2^T[b, t, n] = sum_f U3[f] * x[b, t, f, n]  (VPU mul + small sublane reduce)
    p2t = jnp.sum(xb * u3[:, None], axis=2)                           # (BT, T, N)

    # product[b, s, t] = sum_n part1[b, s, n] * part2[b, n, t]   (batched MXU, K = N)
    product = jnp.einsum('bsn,btn->bst', part1, p2t,
                         preferred_element_type=jnp.float32)          # (BT, T, T)
    sig = jax.nn.sigmoid(product + be)                                # be broadcasts over batch

    # E[b, s, y] = sum_t Ve[s, t] * sig[b, t, y]   (batched across the B_TILE slab)
    ve_b = jnp.broadcast_to(ve[None], (bt, t, t))
    e = jnp.einsum('bst,bty->bsy', ve_b, sig,
                   preferred_element_type=jnp.float32)                # (BT, T, T)

    # softmax over PyTorch dim=1  ->  axis 1 of the (BT, T, T) block.
    m = jnp.max(e, axis=1, keepdims=True)
    ex = jnp.exp(e - m)
    denom = jnp.sum(ex, axis=1, keepdims=True)
    inv = pl.reciprocal(denom, approx=True)          # EUP slot
    inv = inv * (2.0 - denom * inv)                  # one Newton step: near-exact, negligible cost
    out_ref[...] = (ex * inv).astype(out_ref.dtype)


def temporal_attention(x, U1, U2, U3, be, Ve, *, b_tile=None):
    B, N, F_in, T = x.shape

    # Lane-dense layout: put N (the large axis) last. This is exactly the
    # x.permute(0, 3, 2, 1) from the PyTorch forward, done once as wrapper plumbing.
    x_t = jnp.transpose(x, (0, 3, 2, 1))                              # (B, T, F, N)

    itemsize = jnp.dtype(jnp.float32).itemsize
    if b_tile is None:
        b_tile = _choose_b_tile(B, T * F_in * N * itemsize)
    num_tiles = pl.cdiv(B, b_tile)
    b_pad = num_tiles * b_tile
    if b_pad != B:
        x_t = jnp.pad(x_t, ((0, b_pad - B), (0, 0), (0, 0), (0, 0)))

    u1_2d = U1.reshape(1, N)
    u3_2d = U3.reshape(1, F_in)
    be_2d = jnp.reshape(be, (T, T))   # accepts (1, T, T) or (T, T)

    vmem_limit = int(_vmem_capacity_bytes() // 2)

    out = pl.pallas_call(
        _temporal_attention_kernel,
        out_shape=jax.ShapeDtypeStruct((b_pad, T, T), jnp.float32),
        grid_spec=pltpu.PrefetchScalarGridSpec(
            num_scalar_prefetch=0,
            grid=(num_tiles,),
            in_specs=[
                pl.BlockSpec((b_tile, T, F_in, N), lambda i: (i, 0, 0, 0)),  # x (B,T,F,N)
                pl.BlockSpec((1, N), lambda i: (0, 0)),                      # U1
                pl.BlockSpec((F_in, N), lambda i: (0, 0)),                   # U2
                pl.BlockSpec((1, F_in), lambda i: (0, 0)),                   # U3
                pl.BlockSpec((T, T), lambda i: (0, 0)),                      # be
                pl.BlockSpec((T, T), lambda i: (0, 0)),                      # Ve
            ],
            out_specs=pl.BlockSpec((b_tile, T, T), lambda i: (i, 0, 0)),
        ),
        compiler_params=pltpu.CompilerParams(
            dimension_semantics=("parallel",),
            vmem_limit_bytes=vmem_limit,
        ),
    )(x_t, u1_2d, U2, u3_2d, be_2d, Ve)
    return out[:B] if b_pad != B else out


def temporal_attention_reference(x, U1, U2, U3, be, Ve):
    # Pure-JAX reference mirroring the PyTorch forward exactly.
    p1 = jnp.einsum('bnft,n->btf', x, U1)
    p1 = jnp.einsum('btf,fn->btn', p1, U2)
    p2 = jnp.einsum('f,bnft->bnt', U3, x)
    product = jnp.einsum('bsn,bnt->bst', p1, p2)
    e = jnp.einsum('st,bty->bsy', Ve, jax.nn.sigmoid(product + jnp.reshape(be, (1,) + be.shape[-2:])))
    return jax.nn.softmax(e, axis=1)


if __name__ == "__main__":
    # Small shapes, but with enough batch to exercise B_TILE > 1 and a multi-step grid.
    B, N, F_in, T = 8, 16, 4, 8   # batch, num_of_vertices, in_channels, num_of_timesteps

    key = jax.random.PRNGKey(0)
    kx, k1, k2, k3, kb, kv = jax.random.split(key, 6)

    x = jax.random.normal(kx, (B, N, F_in, T), dtype=jnp.float32)
    U1 = jax.random.normal(k1, (N,), dtype=jnp.float32) * 0.1
    U2 = jax.random.normal(k2, (F_in, N), dtype=jnp.float32) * 0.1
    U3 = jax.random.normal(k3, (F_in,), dtype=jnp.float32) * 0.1
    be = jax.random.normal(kb, (1, T, T), dtype=jnp.float32) * 0.1
    Ve = jax.random.normal(kv, (T, T), dtype=jnp.float32) * 0.1

    out = temporal_attention(x, U1, U2, U3, be, Ve)
    out = jax.block_until_ready(out)

    ref = temporal_attention_reference(x, U1, U2, U3, be, Ve)
    assert out.shape == (B, T, T)
    max_err = float(jnp.max(jnp.abs(out - ref)))
    assert jnp.allclose(out, ref, atol=1e-4, rtol=1e-4), (
        f"Pallas kernel mismatch vs reference: max |err| = {max_err}")
    print("KERNEL_OK")
</pallas_src>

<mosaic_0001>
module attributes {stable_mosaic.version = 11 : i64} {
  func.func @_temporal_attention_kernel(%arg0: i32, %arg1: memref<4x8x4x16xf32, #tpu.memory_space<vmem>>, %arg2: memref<1x16xf32, #tpu.memory_space<vmem>>, %arg3: memref<4x16xf32, #tpu.memory_space<vmem>>, %arg4: memref<1x4xf32, #tpu.memory_space<vmem>>, %arg5: memref<8x8xf32, #tpu.memory_space<vmem>>, %arg6: memref<8x8xf32, #tpu.memory_space<vmem>>, %arg7: memref<4x8x8xf32, #tpu.memory_space<vmem>>) attributes {dimension_semantics = [#tpu.dimension_semantics<parallel>], iteration_bounds = array<i64: 2>, scalar_prefetch = 0 : i64, scratch_operands = 0 : i64, tpu.core_type = #tpu.core_type<tc>, window_params = [{transform_indices = @transform_0, window_bounds = array<i64: 4, 8, 4, 16>}, {pipeline_mode = #tpu.pipeline_mode<synchronous>, transform_indices = @transform_1, window_bounds = array<i64: 1, 16>}, {pipeline_mode = #tpu.pipeline_mode<synchronous>, transform_indices = @transform_2, window_bounds = array<i64: 4, 16>}, {pipeline_mode = #tpu.pipeline_mode<synchronous>, transform_indices = @transform_3, window_bounds = array<i64: 1, 4>}, {pipeline_mode = #tpu.pipeline_mode<synchronous>, transform_indices = @transform_4, window_bounds = array<i64: 8, 8>}, {pipeline_mode = #tpu.pipeline_mode<synchronous>, transform_indices = @transform_5, window_bounds = array<i64: 8, 8>}, {transform_indices = @transform_6, window_bounds = array<i64: 4, 8, 8>}]} {
    %c0 = arith.constant 0 : index
    %c0_0 = arith.constant 0 : index
    %c0_1 = arith.constant 0 : index
    %c0_2 = arith.constant 0 : index
    %0 = vector.load %arg1[%c0, %c0_0, %c0_1, %c0_2] : memref<4x8x4x16xf32, #tpu.memory_space<vmem>>, vector<4x8x4x16xf32>
    %c0_3 = arith.constant 0 : index
    %c0_4 = arith.constant 0 : index
    %1 = vector.load %arg2[%c0_3, %c0_4] : memref<1x16xf32, #tpu.memory_space<vmem>>, vector<1x16xf32>
    %2 = vector.shape_cast %1 : vector<1x16xf32> to vector<16xf32>
    %c0_5 = arith.constant 0 : index
    %c0_6 = arith.constant 0 : index
    %3 = vector.load %arg3[%c0_5, %c0_6] : memref<4x16xf32, #tpu.memory_space<vmem>>, vector<4x16xf32>
    %c0_7 = arith.constant 0 : index
    %c0_8 = arith.constant 0 : index
    %4 = vector.load %arg4[%c0_7, %c0_8] : memref<1x4xf32, #tpu.memory_space<vmem>>, vector<1x4xf32>
    %5 = vector.shape_cast %4 : vector<1x4xf32> to vector<4xf32>
    %c0_9 = arith.constant 0 : index
    %c0_10 = arith.constant 0 : index
    %6 = vector.load %arg5[%c0_9, %c0_10] : memref<8x8xf32, #tpu.memory_space<vmem>>, vector<8x8xf32>
    %c0_11 = arith.constant 0 : index
    %c0_12 = arith.constant 0 : index
    %7 = vector.load %arg6[%c0_11, %c0_12] : memref<8x8xf32, #tpu.memory_space<vmem>>, vector<8x8xf32>
    %8 = vector.shape_cast %2 : vector<16xf32> to vector<1x1x1x16xf32>
    %9 = vector.broadcast %8 : vector<1x1x1x16xf32> to vector<4x8x4x16xf32>
    %10 = arith.mulf %0, %9 : vector<4x8x4x16xf32>
    %cst = arith.constant dense<0.000000e+00> : vector<4x8x4xf32>
    %11 = vector.multi_reduction <add>, %10, %cst [3] : vector<4x8x4x16xf32> to vector<4x8x4xf32>
    %12 = vector.shape_cast %11 : vector<4x8x4xf32> to vector<32x4xf32>
    %cst_13 = arith.constant dense<0.000000e+00> : vector<32x16xf32>
    %13 = tpu.matmul %12, %3, %cst_13 {dimension_numbers = #tpu.dot_dimension_numbers<[1], [0], [0], [1], [0, 0, 1, 1], [], []>} : vector<32x4xf32>, vector<4x16xf32>, vector<32x16xf32> -> vector<32x16xf32>
    %14 = vector.shape_cast %13 : vector<32x16xf32> to vector<4x8x16xf32>
    %15 = vector.shape_cast %5 : vector<4xf32> to vector<4x1xf32>
    %16 = vector.shape_cast %15 : vector<4x1xf32> to vector<1x1x4x1xf32>
    %17 = vector.broadcast %16 : vector<1x1x4x1xf32> to vector<4x8x4x16xf32>
    %18 = arith.mulf %0, %17 : vector<4x8x4x16xf32>
    %cst_14 = arith.constant dense<0.000000e+00> : vector<4x8x16xf32>
    %19 = vector.multi_reduction <add>, %18, %cst_14 [2] : vector<4x8x4x16xf32> to vector<4x8x16xf32>
    "tpu.trace_start"() <{level = 10 : i32, message = "bsn,btn->bst"}> : () -> ()
    %cst_15 = arith.constant dense<0.000000e+00> : vector<4x8x8xf32>
    %20 = tpu.matmul %14, %19, %cst_15 {dimension_numbers = #tpu.dot_dimension_numbers<[2], [2], [1], [1], [0, 0, 0, 1, 1, 1], [0], [0]>} : vector<4x8x16xf32>, vector<4x8x16xf32>, vector<4x8x8xf32> -> vector<4x8x8xf32>
    "tpu.trace_stop"() : () -> ()
    %21 = vector.shape_cast %6 : vector<8x8xf32> to vector<1x8x8xf32>
    %22 = vector.broadcast %21 : vector<1x8x8xf32> to vector<4x8x8xf32>
    %23 = arith.addf %20, %22 : vector<4x8x8xf32>
    %24 = arith.negf %23 : vector<4x8x8xf32>
    %25 = math.exp %24 : vector<4x8x8xf32>
    %cst_16 = arith.constant 1.000000e+00 : f32
    %26 = vector.broadcast %cst_16 : f32 to vector<4x8x8xf32>
    %27 = arith.addf %26, %25 : vector<4x8x8xf32>
    %28 = arith.divf %26, %27 : vector<4x8x8xf32>
    %29 = vector.shape_cast %7 : vector<8x8xf32> to vector<1x8x8xf32>
    %30 = vector.shape_cast %29 : vector<1x8x8xf32> to vector<1x8x8xf32>
    %31 = vector.broadcast %30 : vector<1x8x8xf32> to vector<4x8x8xf32>
    "tpu.trace_start"() <{level = 10 : i32, message = "bst,bty->bsy"}> : () -> ()
    %cst_17 = arith.constant dense<0.000000e+00> : vector<4x8x8xf32>
    %32 = tpu.matmul %31, %28, %cst_17 {dimension_numbers = #tpu.dot_dimension_numbers<[2], [1], [1], [2], [0, 0, 0, 1, 1, 2], [0], [0]>} : vector<4x8x8xf32>, vector<4x8x8xf32>, vector<4x8x8xf32> -> vector<4x8x8xf32>
    "tpu.trace_stop"() : () -> ()
    %cst_18 = arith.constant dense<0xFF800000> : vector<4x8xf32>
    %33 = vector.multi_reduction <maximumf>, %32, %cst_18 [1] : vector<4x8x8xf32> to vector<4x8xf32>
    %34 = vector.shape_cast %33 : vector<4x8xf32> to vector<4x1x8xf32>
    %35 = vector.broadcast %34 : vector<4x1x8xf32> to vector<4x8x8xf32>
    %36 = arith.subf %32, %35 : vector<4x8x8xf32>
    %37 = math.exp %36 : vector<4x8x8xf32>
    %cst_19 = arith.constant dense<0.000000e+00> : vector<4x8xf32>
    %38 = vector.multi_reduction <add>, %37, %cst_19 [1] : vector<4x8x8xf32> to vector<4x8xf32>
    %39 = vector.shape_cast %38 : vector<4x8xf32> to vector<4x1x8xf32>
    %40 = tpu.reciprocal %39 {approx = true} : vector<4x1x8xf32> -> vector<4x1x8xf32>
    %41 = arith.mulf %39, %40 : vector<4x1x8xf32>
    %cst_20 = arith.constant 2.000000e+00 : f32
    %42 = vector.broadcast %cst_20 : f32 to vector<4x1x8xf32>
    %43 = arith.subf %42, %41 : vector<4x1x8xf32>
    %44 = arith.mulf %40, %43 : vector<4x1x8xf32>
    %45 = vector.broadcast %44 : vector<4x1x8xf32> to vector<4x8x8xf32>
    %46 = arith.mulf %37, %45 : vector<4x8x8xf32>
    %c0_21 = arith.constant 0 : index
    %c0_22 = arith.constant 0 : index
    %c0_23 = arith.constant 0 : index
    %47 = vector.load %arg7[%c0_21, %c0_22, %c0_23] : memref<4x8x8xf32, #tpu.memory_space<vmem>>, vector<4x8x8xf32>
    tpu.vector_store %arg7[%c0_21, %c0_22, %c0_23], %46 {strides = array<i32>} : memref<4x8x8xf32, #tpu.memory_space<vmem>>, vector<4x8x8xf32>,
    return
  }
  func.func @transform_0(%arg0: i32) -> (i32, i32, i32, i32) {
    %c0_i32 = arith.constant 0 : i32
    %c0_i32_0 = arith.constant 0 : i32
    %c0_i32_1 = arith.constant 0 : i32
    %c0_i32_2 = arith.constant 0 : i32
    return %arg0, %c0_i32, %c0_i32_0, %c0_i32_1 : i32, i32, i32, i32
  }
  func.func @transform_1(%arg0: i32) -> (i32, i32) {
    %c0_i32 = arith.constant 0 : i32
    %c0_i32_0 = arith.constant 0 : i32
    %c0_i32_1 = arith.constant 0 : i32
    return %c0_i32, %c0_i32_0 : i32, i32
  }
  func.func @transform_2(%arg0: i32) -> (i32, i32) {
    %c0_i32 = arith.constant 0 : i32
    %c0_i32_0 = arith.constant 0 : i32
    %c0_i32_1 = arith.constant 0 : i32
    return %c0_i32, %c0_i32_0 : i32, i32
  }
  func.func @transform_3(%arg0: i32) -> (i32, i32) {
    %c0_i32 = arith.constant 0 : i32
    %c0_i32_0 = arith.constant 0 : i32
    %c0_i32_1 = arith.constant 0 : i32
    return %c0_i32, %c0_i32_0 : i32, i32
  }
  func.func @transform_4(%arg0: i32) -> (i32, i32) {
    %c0_i32 = arith.constant 0 : i32
    %c0_i32_0 = arith.constant 0 : i32
    %c0_i32_1 = arith.constant 0 : i32
    return %c0_i32, %c0_i32_0 : i32, i32
  }
  func.func @transform_5(%arg0: i32) -> (i32, i32) {
    %c0_i32 = arith.constant 0 : i32
    %c0_i32_0 = arith.constant 0 : i32
    %c0_i32_1 = arith.constant 0 : i32
    return %c0_i32, %c0_i32_0 : i32, i32
  }
  func.func @transform_6(%arg0: i32) -> (i32, i32, i32) {
    %c0_i32 = arith.constant 0 : i32
    %c0_i32_0 = arith.constant 0 : i32
    %c0_i32_1 = arith.constant 0 : i32
    return %arg0, %c0_i32, %c0_i32_0 : i32, i32, i32
  }
}

</mosaic_0001>

<bundles_post_ra>
// kernel: tpu_custom_call.1
= control target key start
LH: loop header
LB: loop body
LE: loop exit
PB: predicated region body
PF: predicated region fallthrough
CT: control target
= control target key end

     0   :  { %11 = vsyncpa [#allocation3], 0  ;;  %s2909_s0 = inlined_call_operand.hbm [shape: f32[8,8,4,16], index: 0, kind: input, shape index: {}]   ;;  %s2910_s1 = inlined_call_operand.vmem [shape: f32[1,16], index: 1, kind: input, shape index: {}]   ;;  %s2911_s2 = inlined_call_operand.hbm [shape: f32[4,16], index: 2, kind: input, shape index: {}]   ;;  %s2912_s3 = inlined_call_operand.vmem [shape: f32[1,4], index: 3, kind: input, shape index: {}]   ;;  %s2913_s4 = inlined_call_operand.vmem [shape: f32[8,8], index: 4, kind: input, shape index: {}]   ;;  %s2914_s5 = inlined_call_operand.vmem [shape: f32[8,8], index: 5, kind: input, shape index: {}]   ;;  %s2915_s6 = inlined_call_operand.hbm [shape: f32[8,8,8], index: 6, kind: output, shape index: {}]  }
   0x1   :  { %13 = vsyncpa [#allocation3 + $0x1], 0 }
   0x2   :  { %14 = vsyncpa [#allocation6], 0 }
   0x3   :  { %15 = vsyncpa [#allocation4], 0 }
   0x4   :  { %17 = vsyncpa [#allocation4 + $0x1], 0  ;;  %s2255_s21 = smov 0   ;;  %s2257_s22 = smov 0  }
   0x5   :  { %s2259_s23 = smov 0   ;;  %s2261_s24 = smov 0  }
   0x6 LB: > { %s2276_s25 = sadd.s32 4294967295, %s2209_s24   ;;  %s1874_s26 = sadd.s32 4294967294, %s2209_s24   ;;  %s2209_s24 = sphi %s2261_s24, %s2942_s24   ;;  %s2205_s23 = sphi %s2259_s23, %s2941_s23   ;;  %s2201_s22 = sphi %s2257_s22, %s2940_s22   ;;  %s2197_s21 = sphi %s2255_s21, %s2939_s21  }
   0x7   : > { %s2280_s27 = sadd.s32 1, %s2209_s24   ;;  %s30_s28 = sadd.s32 1, %s2205_s23 }
   0x8   : > { %s27_s29 = ssub.s32 %s2209_s24, %s2280_s27  ;;  %p37_p0 = scmp.ne.s32.totalorder %s2205_s23, %s2201_s22 }
   0x9   : > { %p28_p1 = scmp.eq.s32.totalorder %s27_s29, 0  ;;  %p38_p2 = scmp.eq.s32.totalorder %s2209_s24, 0 }
   0xa   : > { %p43_p3 = scmp.ne.s32.totalorder %s2201_s22, %s2197_s21  ;;  %p2916_p4 = scmp.eq.s32.totalorder %s2276_s25, 0 }
   0xb   : > { %s2292_s30 = scalar_select %p28_p1, %s2205_s23, %s30_s28  }
   0xc   : > { %p2294_p5 = por %p38_p2, %p37_p0  ;;  %p2300_p6 = por %p2916_p4, %p43_p3 }
   0xd   : > { %2921 = sst [smem:[#allocation11_spill]] %s2292_s30  ;;  %p172_p7 = scmp.eq.s32.totalorder %s2276_s25, 1 }
   0xe   : > { %s2923_s8 = scalar_select %p2300_p6, 1, 0 }
   0xf   : > { %p178_p8 = scmp.eq.s32.totalorder %s1874_s26, 1  ;;  %p1875_p9 = scmp.ge.s32.totalorder %s2209_s24, 1 }
  0x10   : > { %p185_p10 = scmp.lt.s32.totalorder %s2209_s24, 3  ;;  %p2307_p11 = por %p172_p7, %p37_p0 }
  0x11   : > { %p2311_p12 = por %p178_p8, %p43_p3  ;;  %s2211_s12 = smov [#allocation5]  }
  0x12   : > { %s2924_s9 = scalar_select %p2307_p11, 1, 0 }
  0x13   : > { %s2925_s10 = scalar_select %p2311_p12, 1, 0 }
  0x14   : > { %p2315_p13 = pnand %p1875_p9, %p185_p10  ;;  %s201_s13 = sshll.u32 %s2211_s12, 4  ;;  %s202_s13 = int_to_ptr.vmem [resolvable:$true] %s201_s13 }
  0x15   : > { %p2007_p4 = scmp.lt.s32.totalorder %s2209_s24, 2  ;;  %p2927_p0 = scmp.eq.s32.totalorder %s2276_s25, 0 }
  0x16   : > { %s2926_s11 = scalar_select %p2315_p13, 1, 0 }
  0x17   : > { %p1994_p2 = pneg %p2315_p13  ;;  %s221_s15 = sand.u32 1, %s2205_s23  }
  0x18   : > { %p2332_p3 = pnand %p2007_p4, %p2294_p5  ;;  %s1878_s17 = sshll.u32 %s221_s15, 7 }
  0x19   : > { %p2325_p7 = pnand %p1994_p2, %p2927_p0  ;;  %s2081_s20 = scalar_lea.hbm %s2911_s2, 64 }
  0x1a   : > { %s2929_s16 = scalar_select %p2332_p3, 1, 0 }
  0x1b   : > { %p2082_p8 = scmp.ne.s32.totalorder %s2911_s2, %s2081_s20  ;;  %p2083_p9 = pneg %p2325_p7 }
  0x1c   : > { %p2088_p4 = scmp.lt.u32.totalorder %s2081_s20, %s2911_s2 }
  0x1d   : > { %p2084_p10 = pnand %p2083_p9, %p2082_p8 }
  0x1f   : > { %p2085_p2 = pneg %p2084_p10 }
  0x21   : > { %p2090_p5 = pnand %p2088_p4, %p2085_p2 }
  0x23   : > { %2093 = shalt.err (!%p2090_p5)
}
  0x24   : > { %s2094_s7 = scalar_lea.vmem %s202_s13, 64  ;;  %p2102_p11 = scmp.lt.s32.totalorder %s202_s13, %s202_s13 }
  0x25   : > { %p2095_p0 = scmp.ne.s32.totalorder %s202_s13, %s2094_s7  ;;  %p2103_p6 = scmp.lt.s32.totalorder %s2094_s7, %s2094_s7 }
  0x27   : > { %p2097_p1 = pnand %p2095_p0, %p2083_p9  ;;  %p2104_p13 = por %p2103_p6, %p2102_p11 }
  0x29   : > { %p2098_p12 = pneg %p2097_p1 }
  0x2b   : > { %p2105_p3 = pnand %p2104_p13, %p2098_p12 }
  0x2d   : > { %2108 = shalt.err (!%p2105_p3)
}
  0x2e   : > { %1997 = dma.hbm_to_vmem [thread:$0]  (!%p2325_p7), %s2911_s2, 64, %s202_s13, [#allocation6]  }
  0x2f   : > { %s1915_s20 = sshll.u32 %s2209_s24, 11  ;;  %s225_s26 = scalar_lea.vmem [#allocation2], %s1878_s17 }
  0x30   : > { %s233_s28 = sshll.u32 %s225_s26, 4  ;;  %s2356_s30 = scalar_lea.hbm %s2909_s0, %s1915_s20  ;;  %s2358_s28 = int_to_ptr.vmem [resolvable:$true] %s233_s28 }
  0x31   : > { %s2360_s14 = scalar_lea.sflag [#allocation3], %s221_s15  ;;  %s2109_s7 = scalar_lea.hbm %s2356_s30, 2048 }
  0x32   : > { %p2110_p6 = scmp.ne.s32.totalorder %s2356_s30, %s2109_s7  ;;  %p2930_p11 = scmp.ne.s32.totalorder %s2929_s16, 0 }
  0x33   : > { %s2114_s18 = scalar_lea.hbm %s2909_s0, 4096  ;;  %p2115_p7 = scmp.lt.u32.totalorder %s2356_s30, %s2909_s0 }
  0x34   : > { %p2111_p12 = pneg %p2930_p11  ;;  %p2116_p3 = scmp.lt.u32.totalorder %s2114_s18, %s2109_s7 }
  0x35   : > { %p2118_p9 = scmp.lt.u32.totalorder %s2109_s7, %s2356_s30 }
  0x36   : > { %p2112_p13 = pnand %p2111_p12, %p2110_p6  ;;  %p2117_p8 = por %p2116_p3, %p2115_p7 }
  0x38   : > { %p2113_p1 = pneg %p2112_p13  ;;  %p2119_p10 = por %p2118_p9, %p2117_p8 }
  0x3a   : > { %p2120_p2 = pnand %p2119_p10, %p2113_p1 }
  0x3c   : > { %2123 = shalt.err (!%p2120_p2)
}
  0x3d   : > { %s2124_s15 = scalar_lea.vmem %s2358_s28, 2048  ;;  %s2212_s26 = smov [#allocation2]  }
  0x3e   : > { %p2125_p4 = scmp.ne.s32.totalorder %s2358_s28, %s2124_s15  ;;  %s2129_s29 = sshll.u32 %s2212_s26, 4  ;;  %s2130_s29 = int_to_ptr.vmem [resolvable:$false] %s2129_s29 }
  0x3f   : > { %s2131_s12 = scalar_lea.vmem %s2130_s29, 4096  ;;  %p2132_p6 = scmp.lt.s32.totalorder %s2358_s28, %s2130_s29 }
  0x40   : > { %p2127_p5 = pnand %p2125_p4, %p2111_p12  ;;  %p2133_p13 = scmp.lt.s32.totalorder %s2131_s12, %s2124_s15 }
  0x42   : > { %p2128_p0 = pneg %p2127_p5  ;;  %p2134_p7 = por %p2133_p13, %p2132_p6 }
  0x44   : > { %p2135_p3 = pnand %p2134_p7, %p2128_p0 }
  0x46   : > { %2138 = shalt.err (!%p2135_p3)
}
  0x47   : > { %s2213_s7 = smov 64   ;;  %s2214_s13 = smov 4  }
  0x48   : > { %2001 = dma.hbm_to_vmem [thread:$0]  (!%p2930_p11), %s2356_s30, 2048, %s2358_s28, %s2360_s14, %s2213_s7, %s2213_s7, %s2214_s13  }
  0x49   : > { %p2931_p12 = scmp.ne.s32.totalorder %s2926_s11, 0 }
  0x4a   : > { %s2391_s17 = sand.u32 (!%p2931_p12), 1, %s2201_s22   ;;  %p2932_p1 = scmp.ne.s32.totalorder (!%p2931_p12), %s2923_s8, 0 }
  0x4b   : > { %245 = sbr.rel (%p2931_p12) target bundleno = 1038 (0x40e), region = 44  ;;  %s1883_s18 = sshll.u32 (!%p2931_p12), %s2391_s17, 7 }
  0x4c   : > { %s248_s19 = scalar_lea.sflag (!%p2931_p12), [#allocation3], %s2391_s17  ;;  %s2395_s20 = scalar_lea.vmem (!%p2931_p12), [#allocation2], %s1883_s18 }
  0x52   : > { %2184 = dma.done.wait (%p2932_p1), %s248_s19, 2048  }
  0x53   : > { %2186 = vsyncadd (%p2932_p1), %s248_s19, 4294965248  ;;  %p2933_p11 = scmp.eq.s32.totalorder %s2276_s25, 0 }
  0x55   : > { %2188 = dma.done.wait (%p2933_p11), [#allocation6], 64   ;;  %p2934_p8 = pmov %p2933_p11 }
  0x56   : > { %vm361_vm0 = vcmask 125952   ;;  %v2406_v0 = vld [vmem:[%s2395_s20 + $0x8] sm:$0xf]  ;;  %v2411_v1 = vld [vmem:[%s2910_s1] ss:$0 sm:$0xff]  ;;  %vm664_vm1 = vcmask 1043456  }
  0x57   : > { %2190 = vsyncadd (%p2934_p8), [#allocation6], 4294967232  ;;  %v2414_v2 = vld [vmem:[%s2395_s20] sm:$0xf]  ;;  %v331_v3 = vmul.f32 %v2411_v1, %v2406_v0  ;;  %v2424_v6 = vld [vmem:[%s2395_s20 + $0x4] sm:$0xf] }
  0x58   : > { %v329_v4 = vmul.f32 %v2411_v1, %v2414_v2  ;;  %v2421_v5 = vld [vmem:[%s2395_s20 + $0x20] sm:$0xf]  ;;  %v330_v8 = vmul.f32 %v2411_v1, %v2424_v6  ;;  %v2431_v9 = vld [vmem:[%s2395_s20 + $0xc] sm:$0xf]  ;;  %v2434_v10 = vld [vmem:[%s2395_s20 + $0x24] sm:$0xf] }
  0x59   : > { %v337_v7 = vmul.f32 %v2411_v1, %v2421_v5  ;;  %v368_v11 = vsel %vm361_vm0, %v331_v3, 0.0  ;;  %v332_v15 = vmul.f32 %v2411_v1, %v2431_v9  ;;  %v338_v16 = vmul.f32 %v2411_v1, %v2434_v10  ;;  %v2445_v17 = vld [vmem:[%s2395_s20 + $0x10] sm:$0xf]  ;;  %v2448_v18 = vld [vmem:[%s2395_s20 + $0x28] sm:$0xf]  ;;  %s1885_s29 = sshll.u32 %s2391_s17, 5 }
  0x5a   : > { %v362_v12 = vsel %vm361_vm0, %v329_v4, 0.0  ;;  %369 = vadd.xlane.f32.xlu1 %v368_v11  ;;  %v365_v14 = vsel %vm361_vm0, %v330_v8, 0.0  ;;  %v333_v21 = vmul.f32 %v2411_v1, %v2445_v17  ;;  %v339_v22 = vmul.f32 %v2411_v1, %v2448_v18  ;;  %v2457_v23 = vld [vmem:[%s2395_s20 + $0x14] sm:$0xf]  ;;  %v2460_v24 = vld [vmem:[%s2395_s20 + $0x2c] sm:$0xf] }
  0x5b   : > { %363 = vadd.xlane.f32.xlu0 %v362_v12  ;;  %v386_v13 = vsel %vm361_vm0, %v337_v7, 0.0  ;;  %v371_v19 = vsel %vm361_vm0, %v332_v15, 0.0  ;;  %v389_v20 = vsel %vm361_vm0, %v338_v16, 0.0  ;;  %v334_v27 = vmul.f32 %v2411_v1, %v2457_v23  ;;  %v2469_v29 = vld [vmem:[%s2395_s20 + $0x18] sm:$0xf]  ;;  %s2847_s12 = scalar_lea.vmem [#allocation7], %s1885_s29 }
  0x5c   : > { %v374_v25 = vsel %vm361_vm0, %v333_v21, 0.0  ;;  %v392_v26 = vsel %vm361_vm0, %v339_v22, 0.0  ;;  %v340_v28 = vmul.f32 %v2411_v1, %v2460_v24  ;;  %v2472_v30 = vld [vmem:[%s2395_s20 + $0x30] sm:$0xf]  ;;  %v335_v33 = vmul.f32 %v2411_v1, %v2469_v29  ;;  %v2481_v35 = vld [vmem:[%s2395_s20 + $0x1c] sm:$0xf] }
  0x5d   : > { %v377_v31 = vsel %vm361_vm0, %v334_v27, 0.0  ;;  %v341_v34 = vmul.f32 %v2411_v1, %v2472_v30  ;;  %v2484_v36 = vld [vmem:[%s2395_s20 + $0x34] sm:$0xf]  ;;  %v336_v39 = vmul.f32 %v2411_v1, %v2481_v35  ;;  %v2493_v41 = vld [vmem:[%s2395_s20 + $0x3c] sm:$0xf]  ;;  %vm620_vm2 = vcmask 1041409  }
  0x5e   : > { %387 = vadd.xlane.f32.xlu1 %v386_v13  ;;  %v395_v32 = vsel %vm361_vm0, %v340_v28, 0.0  ;;  %v380_v37 = vsel %vm361_vm0, %v335_v33, 0.0  ;;  %v342_v40 = vmul.f32 %v2411_v1, %v2484_v36  ;;  %v2496_v42 = vld [vmem:[%s2395_s20 + $0x38] sm:$0xf]  ;;  %v344_v45 = vmul.f32 %v2411_v1, %v2493_v41  ;;  %v2505_v47 = vld [vmem:[%s2395_s20 + $0x44] sm:$0xf] }
  0x5f   : > { %366 = vadd.xlane.f32.xlu0 %v365_v14  ;;  %v398_v38 = vsel %vm361_vm0, %v341_v34, 0.0  ;;  %v383_v43 = vsel %vm361_vm0, %v336_v39, 0.0  ;;  %v343_v46 = vmul.f32 %v2411_v1, %v2496_v42  ;;  %v2508_v48 = vld [vmem:[%s2395_s20 + $0x40] sm:$0xf]  ;;  %v346_v51 = vmul.f32 %v2411_v1, %v2505_v47  ;;  %v2520_v54 = vld [vmem:[%s2395_s20 + $0x48] sm:$0xf] }
  0x60   : > { %v401_v44 = vsel %vm361_vm0, %v342_v40, 0.0  ;;  %v407_v49 = vsel %vm361_vm0, %v344_v45, 0.0  ;;  %v345_v52 = vmul.f32 %v2411_v1, %v2508_v48  ;;  %v2517_v53 = vld [vmem:[%s2395_s20 + $0x60] sm:$0xf]  ;;  %v347_v58 = vmul.f32 %v2411_v1, %v2520_v54  ;;  %v2529_v59 = vld [vmem:[%s2395_s20 + $0x4c] sm:$0xf] }
  0x61   : > { %v404_v50 = vsel %vm361_vm0, %v343_v46, 0.0  ;;  %v413_v55 = vsel %vm361_vm0, %v346_v51, 0.0  ;;  %v353_v57 = vmul.f32 %v2411_v1, %v2517_v53  ;;  %v2532_v60 = vld [vmem:[%s2395_s20 + $0x64] sm:$0xf]  ;;  %v348_v63 = vmul.f32 %v2411_v1, %v2529_v59  ;;  %v2541_v4 = vld [vmem:[%s2395_s20 + $0x50] sm:$0xf] }
  0x62   : > { %372 = vadd.xlane.f32.xlu1 %v371_v19  ;;  %v410_v56 = vsel %vm361_vm0, %v345_v52, 0.0  ;;  %v416_v62 = vsel %vm361_vm0, %v347_v58, 0.0  ;;  %v354_v3 = vmul.f32 %v2411_v1, %v2532_v60  ;;  %v2544_v7 = vld [vmem:[%s2395_s20 + $0x68] sm:$0xf]  ;;  %v349_v12 = vmul.f32 %v2411_v1, %v2541_v4  ;;  %v2553_v14 = vld [vmem:[%s2395_s20 + $0x54] sm:$0xf] }
  0x63   : > { %390 = vadd.xlane.f32.xlu0 %v389_v20  ;;  %v434_v61 = vsel %vm361_vm0, %v353_v57, 0.0  ;;  %v419_v8 = vsel %vm361_vm0, %v348_v63, 0.0  ;;  %v355_v13 = vmul.f32 %v2411_v1, %v2544_v7  ;;  %v2556_v15 = vld [vmem:[%s2395_s20 + $0x6c] sm:$0xf]  ;;  %v350_v20 = vmul.f32 %v2411_v1, %v2553_v14  ;;  %v2565_v22 = vld [vmem:[%s2395_s20 + $0x58] sm:$0xf] }
  0x64   : > { %v437_v11 = vsel %vm361_vm0, %v354_v3, 0.0  ;;  %v422_v16 = vsel %vm361_vm0, %v349_v12, 0.0  ;;  %v356_v21 = vmul.f32 %v2411_v1, %v2556_v15  ;;  %v2577_v33 = vld [vmem:[%s2395_s20 + $0x5c] sm:$0xf]  ;;  %v2580_v34 = vld [vmem:[%s2395_s20 + $0x74] sm:$0xf] }
  0x65   : > { %v440_v19 = vsel %vm361_vm0, %v355_v13, 0.0  ;;  %v425_v27 = vsel %vm361_vm0, %v350_v20, 0.0  ;;  %v352_v39 = vmul.f32 %v2411_v1, %v2577_v33  ;;  %v358_v40 = vmul.f32 %v2411_v1, %v2580_v34  ;;  %s1916_s7 = sshll.u32 %s2276_s25, 9  ;;  %s1791_s13 = sshll.u32 %s2847_s12, 4  ;;  %s2861_s13 = int_to_ptr.vmem [resolvable:$true] %s1791_s13 }
  0x66   : > { %375 = vadd.xlane.f32.xlu1 %v374_v25  ;;  %v2568_v25 = vld [vmem:[%s2395_s20 + $0x70] sm:$0xf]  ;;  %v443_v28 = vsel %vm361_vm0, %v356_v21, 0.0  ;;  %vm622_vm3 = vcmask 1042434   ;;  %vm624_vm4 = vcmask 1043459   ;;  %vm626_vm5 = vcmask 1044484  }
  0x67   : > { %393 = vadd.xlane.f32.xlu0 %v392_v26  ;;  %v319_v26 = vld [vmem:[#allocation5] sm:$0xf]  ;;  %v431_v45 = vsel %vm361_vm0, %v352_v39, 0.0  ;;  %v449_v46 = vsel %vm361_vm0, %v358_v40, 0.0  ;;  %vm628_vm6 = vcmask 1045509   ;;  %vm630_vm7 = vcmask 1046534  }
  0x68   : > { %1938 = vmatprep.subr.msk.mxu0 %vm664_vm1, %v319_v26  ;;  %vm632_vm8 = vcmask 1047559   ;;  %vm655_vm9 = vcmask 31744   ;;  %vm1031_vm10 = vcmask 130048   ;;  %vm2216_vm11 = vmmov 0   ;;  %s1778_s25 = scalar_lea.sflag [#allocation4], %s2391_s17  ;;  %s2139_s30 = scalar_lea.vmem %s2861_s13, 512 }
  0x69   : > { %1939 = vmatpush3.msk.msra.mxu0 %vm664_vm1, %v319_v26  ;;  %vm1401_vm12 = vcmask 64512   ;;  %p2140_p9 = scmp.ne.s32.totalorder %s2861_s13, %s2139_s30  ;;  %p2935_p10 = scmp.ne.s32.totalorder %s2924_s9, 0 }
  0x6a   : > { %378 = vadd.xlane.f32.xlu1 %v377_v31  ;;  %v351_v31 = vmul.f32 %v2411_v1, %v2565_v22  ;;  %s2217_s11 = smov [#allocation7]  }
  0x6b   : > { %396 = vadd.xlane.f32.xlu0 %v395_v32  ;;  %v357_v32 = vmul.f32 %v2411_v1, %v2568_v25  ;;  %p2141_p2 = pnand %p2140_p9, %p2935_p10  ;;  %s2143_s8 = sshll.u32 %s2217_s11, 4  ;;  %s2144_s8 = int_to_ptr.vmem [resolvable:$false] %s2143_s8 }
  0x6c   : > { %s2145_s16 = scalar_lea.vmem %s2144_s8, 1024  ;;  %p2146_p5 = scmp.lt.s32.totalorder %s2861_s13, %s2144_s8 }
  0x6d   : > { %p2142_p4 = pneg %p2141_p2  ;;  %p2147_p0 = scmp.lt.s32.totalorder %s2145_s16, %s2139_s30 }
  0x6e   : > { %381 = vadd.xlane.f32.xlu1 %v380_v37  ;;  %v428_v37 = vsel %vm361_vm0, %v351_v31, 0.0 }
  0x6f   : > { %399 = vadd.xlane.f32.xlu0 %v398_v38  ;;  %v446_v38 = vsel %vm361_vm0, %v357_v32, 0.0  ;;  %p2148_p6 = por %p2147_p0, %p2146_p5 }
  0x71   : > { %p2149_p13 = pnand %p2148_p6, %p2142_p4 }
  0x72   : > { %384 = vadd.xlane.f32.xlu1 %v383_v43  ;;  %v2589_v43 = vld [vmem:[%s2395_s20 + $0x78] sm:$0xf] }
  0x73   : > { %402 = vadd.xlane.f32.xlu0 %v401_v44  ;;  %v2592_v44 = vld [vmem:[%s2395_s20 + $0x7c] sm:$0xf]  ;;  %s2859_s20 = scalar_lea.hbm %s2915_s6, %s1916_s7 }
  0x76   : > { %408 = vadd.xlane.f32.xlu1 %v407_v49  ;;  %v359_v49 = vmul.f32 %v2411_v1, %v2589_v43 }
  0x77   : > { %405 = vadd.xlane.f32.xlu0 %v404_v50  ;;  %v360_v50 = vmul.f32 %v2411_v1, %v2592_v44 }
  0x78   : > { %v452_v51 = vsel %vm361_vm0, %v359_v49, 0.0 }
  0x79   : > { %v455_v52 = vsel %vm361_vm0, %v360_v50, 0.0 }
  0x7a   : > { %414 = vadd.xlane.f32.xlu1 %v413_v55  ;;  %v1892_v55 = vld [vmem:[%s2912_s3] ss:$0 sm:$0xff] }
  0x7b   : > { %411 = vadd.xlane.f32.xlu0 %v410_v56  ;;  %v2215_v56 = vmov 0.0  }
  0x7c   : > { %1946 = vmatprep.subr.mxu1 %v2215_v56  ;;  %1956 = vmatprep.subr.mxu0 %v2215_v56 }
  0x7d   : > { %1948 = vmatprep.mubr.msk.f32.mxu1 %vm2216_vm11, %v2215_v56 }
  0x7e   : > { %435 = vadd.xlane.f32.xlu1 %v434_v61 }
  0x7f   : > { %417 = vadd.xlane.f32.xlu0 %v416_v62  ;;  %v490_v62 = vlaneseq }
  0x82   : > { %420 = vadd.xlane.f32.xlu1 %v419_v8  ;;  %v491_v8 = vand.u32 127, %v490_v62 }
  0x83   : > { %438 = vadd.xlane.f32.xlu0 %v437_v11  ;;  %v493_v11 = vshrl.u32 %v490_v62, 7 }
  0x86   : > { %423 = vadd.xlane.f32.xlu1 %v422_v16  ;;  %v2607_v16 = vsub.s32 %v491_v8, %v493_v11 }
  0x87   : > { %441 = vadd.xlane.f32.xlu0 %v440_v19 }
  0x8a   : > { %426 = vadd.xlane.f32.xlu1 %v425_v27 }
  0x8b   : > { %444 = vadd.xlane.f32.xlu0 %v443_v28 }
  0x8e   : > { %429 = vadd.xlane.f32.xlu1 %v428_v37 }
  0x8f   : > { %447 = vadd.xlane.f32.xlu0 %v446_v38 }
  0x92   : > { %432 = vadd.xlane.f32.xlu1 %v431_v45 }
  0x93   : > { %450 = vadd.xlane.f32.xlu0 %v449_v46 }
  0x96   : > { %456 = vadd.xlane.f32.xlu1 %v455_v52 }
  0x97   : > { %453 = vadd.xlane.f32.xlu0 %v452_v51 }
  0xad   : > { %758 = vbcast.lane.b32.xlu0 %v1892_v55, 256 }
  0xe7   : > { %v370_v57 = vpop.xlane.xlu1 %369 }
  0xe8   : > { %v364_v1 = vpop.xlane.xlu0 %363  ;;  %v503_v31 = vrot.slane %v370_v57, %v2607_v16 }
  0xe9   : > { %v495_v26 = vrot.slane %v364_v1, %v2607_v16 }
  0xeb   : > { %v388_v58 = vpop.xlane.xlu1 %387 }
  0xec   : > { %v367_v61 = vpop.xlane.xlu0 %366  ;;  %v527_v51 = vrot.slane %v388_v58, %v2607_v16 }
  0xed   : > { %v499_v19 = vrot.slane %v367_v61, %v2607_v16 }
  0xef   : > { %v373_v63 = vpop.xlane.xlu1 %372  ;;  %v621_v27 = vsel %vm620_vm2, %v499_v19, %v495_v26 }
  0xf0   : > { %v391_v3 = vpop.xlane.xlu0 %390  ;;  %v507_v28 = vrot.slane %v373_v63, %v2607_v16  ;;  %v623_v40 = vsel %vm622_vm3, %v503_v31, %v621_v27 }
  0xf1   : > { %v531_v45 = vrot.slane %v391_v3, %v2607_v16 }
  0xf2   : > { %v625_v49 = vsel %vm624_vm4, %v507_v28, %v623_v40 }
  0xf3   : > { %v376_v12 = vpop.xlane.xlu1 %375  ;;  %v634_v3 = vsel %vm620_vm2, %v531_v45, %v527_v51 }
  0xf4   : > { %v394_v13 = vpop.xlane.xlu0 %393  ;;  %v511_v32 = vrot.slane %v376_v12, %v2607_v16 }
  0xf5   : > { %v535_v50 = vrot.slane %v394_v13, %v2607_v16 }
  0xf6   : > { %v627_v52 = vsel %vm626_vm5, %v511_v32, %v625_v49 }
  0xf7   : > { %v379_v20 = vpop.xlane.xlu1 %378  ;;  %v635_v11 = vsel %vm622_vm3, %v535_v50, %v634_v3 }
  0xf8   : > { %v397_v21 = vpop.xlane.xlu0 %396  ;;  %v515_v39 = vrot.slane %v379_v20, %v2607_v16 }
  0xf9   : > { %v539_v55 = vrot.slane %v397_v21, %v2607_v16 }
  0xfa   : > { %v629_v63 = vsel %vm628_vm6, %v515_v39, %v627_v52 }
  0xfb   : > { %v382_v37 = vpop.xlane.xlu1 %381  ;;  %v636_v13 = vsel %vm624_vm4, %v539_v55, %v635_v11 }
  0xfc   : > { %v400_v38 = vpop.xlane.xlu0 %399  ;;  %v519_v46 = vrot.slane %v382_v37, %v2607_v16 }
  0xfd   : > { %v543_v61 = vrot.slane %v400_v38, %v2607_v16 }
  0xfe   : > { %v631_v58 = vsel %vm630_vm7, %v519_v46, %v629_v63 }
  0xff   : > { %v385_v57 = vpop.xlane.xlu1 %384  ;;  %v637_v21 = vsel %vm626_vm5, %v543_v61, %v636_v13 }
 0x100   : > { %v403_v1 = vpop.xlane.xlu0 %402  ;;  %v523_v62 = vrot.slane %v385_v57, %v2607_v16 }
 0x101   : > { %v547_v8 = vrot.slane %v403_v1, %v2607_v16 }
 0x102   : > { %v633_v12 = vsel %vm632_vm8, %v523_v62, %v631_v58 }
 0x103   : > { %v409_v19 = vpop.xlane.xlu1 %408  ;;  %1940 = vmatprep.mubr.msk.f32.mxu0 %vm655_vm9, %v633_v12  ;;  %v638_v28 = vsel %vm628_vm6, %v547_v8, %v637_v21 }
 0x104   : > { %v406_v20 = vpop.xlane.xlu0 %405  ;;  %v555_v26 = vrot.slane %v409_v19, %v2607_v16 }
 0x105   : > { %v551_v27 = vrot.slane %v406_v20, %v2607_v16 }
 0x107   : > { %v639_v31 = vsel %vm630_vm7, %v551_v27, %v638_v28  ;;  %v415_v32 = vpop.xlane.xlu1 %414 }
 0x108   : > { %v412_v37 = vpop.xlane.xlu0 %411  ;;  %v640_v38 = vsel %vm632_vm8, %v555_v26, %v639_v31  ;;  %v563_v55 = vrot.slane %v415_v32, %v2607_v16 }
 0x109   : > { %1941 = vmatmul.mubr.msk.f32.vlgmr.msra.gmra.mrb[0].mxu0 %vm655_vm9, %v640_v38  ;;  %v559_v57 = vrot.slane %v412_v37, %v2607_v16 }
 0x10b   : > { %v436_v39 = vpop.xlane.xlu1 %435  ;;  %v641_v8 = vsel %vm620_vm2, %v563_v55, %v559_v57 }
 0x10c   : > { %v418_v40 = vpop.xlane.xlu0 %417  ;;  %v591_v21 = vrot.slane %v436_v39, %v2607_v16 }
 0x10d   : > { %v567_v1 = vrot.slane %v418_v40, %v2607_v16 }
 0x10f   : > { %v421_v45 = vpop.xlane.xlu1 %420  ;;  %v642_v11 = vsel %vm622_vm3, %v567_v1, %v641_v8 }
 0x110   : > { %v439_v46 = vpop.xlane.xlu0 %438  ;;  %v571_v61 = vrot.slane %v421_v45, %v2607_v16 }
 0x111   : > { %v595_v12 = vrot.slane %v439_v46, %v2607_v16 }
 0x112   : > { %v643_v19 = vsel %vm624_vm4, %v571_v61, %v642_v11 }
 0x113   : > { %v424_v49 = vpop.xlane.xlu1 %423  ;;  %v648_v40 = vsel %vm620_vm2, %v595_v12, %v591_v21 }
 0x114   : > { %v442_v50 = vpop.xlane.xlu0 %441  ;;  %v575_v62 = vrot.slane %v424_v49, %v2607_v16 }
 0x115   : > { %v599_v20 = vrot.slane %v442_v50, %v2607_v16 }
 0x116   : > { %v644_v26 = vsel %vm626_vm5, %v575_v62, %v643_v19 }
 0x117   : > { %v427_v51 = vpop.xlane.xlu1 %426  ;;  %v649_v39 = vsel %vm622_vm3, %v599_v20, %v648_v40 }
 0x118   : > { %v445_v52 = vpop.xlane.xlu0 %444  ;;  %v579_v58 = vrot.slane %v427_v51, %v2607_v16 }
 0x119   : > { %v603_v27 = vrot.slane %v445_v52, %v2607_v16 }
 0x11a   : > { %v645_v32 = vsel %vm628_vm6, %v579_v58, %v644_v26 }
 0x11b   : > { %v430_v63 = vpop.xlane.xlu1 %429  ;;  %v650_v50 = vsel %vm624_vm4, %v603_v27, %v649_v39 }
 0x11c   : > { %v448_v3 = vpop.xlane.xlu0 %447  ;;  %v583_v13 = vrot.slane %v430_v63, %v2607_v16 }
 0x11d   : > { %v607_v37 = vrot.slane %v448_v3, %v2607_v16 }
 0x11e   : > { %v646_v45 = vsel %vm630_vm7, %v583_v13, %v645_v32 }
 0x11f   : > { %v433_v28 = vpop.xlane.xlu1 %432  ;;  %v651_v55 = vsel %vm626_vm5, %v607_v37, %v650_v50 }
 0x120   : > { %v451_v31 = vpop.xlane.xlu0 %450  ;;  %v587_v38 = vrot.slane %v433_v28, %v2607_v16 }
 0x121   : > { %v611_v46 = vrot.slane %v451_v31, %v2607_v16 }
 0x122   : > { %v647_v49 = vsel %vm632_vm8, %v587_v38, %v646_v45 }
 0x123   : > { %1943 = vmatprep.mubr.msk.f32.mxu0 %vm655_vm9, %v647_v49  ;;  %v457_v52 = vpop.xlane.xlu1 %456  ;;  %v652_v61 = vsel %vm628_vm6, %v611_v46, %v651_v55 }
 0x124   : > { %v454_v51 = vpop.xlane.xlu0 %453  ;;  %v619_v1 = vrot.slane %v457_v52, %v2607_v16 }
 0x125   : > { %v615_v57 = vrot.slane %v454_v51, %v2607_v16 }
 0x127   : > { %v653_v62 = vsel %vm630_vm7, %v615_v57, %v652_v61 }
 0x128   : > { %v654_v63 = vsel %vm632_vm8, %v619_v1, %v653_v62  ;;  %v2672_v3 = vpop.permute.xlu0 %758 }
 0x129   : > { %1944 = vmatmul.mubr.msk.f32.gmra.mrb[2].mxu0 %vm655_vm9, %v654_v63  ;;  %v760_v8 = vmul.f32 %v2672_v3, %v2414_v2  ;;  %v761_v58 = vmul.f32 %v2672_v3, %v2424_v6  ;;  %v762_v11 = vmul.f32 %v2672_v3, %v2406_v0  ;;  %v763_v16 = vmul.f32 %v2672_v3, %v2431_v9 }
 0x12a   : > { %v764_v12 = vmul.f32 %v2672_v3, %v2445_v17  ;;  %v765_v13 = vmul.f32 %v2672_v3, %v2457_v23  ;;  %v766_v19 = vmul.f32 %v2672_v3, %v2469_v29  ;;  %v767_v2 = vmul.f32 %v2672_v3, %v2481_v35  ;;  %1958 = vmatprep.mubr.msk.f32.mxu0 %vm2216_vm11, %v2215_v56 }
 0x12b   : > { %v792_v6 = vsel %vm361_vm0, %v760_v8, 0.0  ;;  %v799_v20 = vsel %vm361_vm0, %v761_v58, 0.0  ;;  %v806_v0 = vsel %vm361_vm0, %v762_v11, 0.0  ;;  %v813_v9 = vsel %vm361_vm0, %v763_v16, 0.0 }
 0x12c   : > { %v793_v21 = vrot.slane %v792_v6, 4  ;;  %v800_v26 = vrot.slane %v799_v20, 4  ;;  %v807_v17 = vrot.slane %v806_v0, 4  ;;  %v814_v27 = vrot.slane %v813_v9, 4 }
 0x12d   : > { %v820_v23 = vsel %vm361_vm0, %v764_v12, 0.0  ;;  %v827_v28 = vsel %vm361_vm0, %v765_v13, 0.0  ;;  %v834_v29 = vsel %vm361_vm0, %v766_v19, 0.0  ;;  %v841_v35 = vsel %vm361_vm0, %v767_v2, 0.0 }
 0x12e   : > { %v794_v31 = vadd.f32 %v793_v21, %v792_v6  ;;  %v801_v32 = vadd.f32 %v800_v26, %v799_v20  ;;  %v808_v37 = vadd.f32 %v807_v17, %v806_v0  ;;  %v815_v38 = vadd.f32 %v814_v27, %v813_v9 }
 0x12f   : > { %v821_v40 = vrot.slane %v820_v23, 4  ;;  %v828_v45 = vrot.slane %v827_v28, 4  ;;  %v835_v46 = vrot.slane %v834_v29, 4  ;;  %v842_v39 = vrot.slane %v841_v35, 4 }
 0x130   : > { %v795_v49 = vrot.slane %v794_v31, 2  ;;  %v802_v50 = vrot.slane %v801_v32, 2  ;;  %v809_v51 = vrot.slane %v808_v37, 2  ;;  %v816_v52 = vrot.slane %v815_v38, 2 }
 0x131   : > { %v822_v55 = vadd.f32 %v821_v40, %v820_v23  ;;  %v829_v57 = vadd.f32 %v828_v45, %v827_v28  ;;  %v836_v1 = vadd.f32 %v835_v46, %v834_v29  ;;  %v843_v61 = vadd.f32 %v842_v39, %v841_v35 }
 0x132   : > { %v796_v62 = vadd.f32 %v795_v49, %v794_v31  ;;  %v803_v63 = vadd.f32 %v802_v50, %v801_v32  ;;  %v810_v8 = vadd.f32 %v809_v51, %v808_v37  ;;  %v817_v58 = vadd.f32 %v816_v52, %v815_v38 }
 0x133   : > { %v823_v11 = vrot.slane %v822_v55, 2  ;;  %v830_v16 = vrot.slane %v829_v57, 2  ;;  %v837_v12 = vrot.slane %v836_v1, 2  ;;  %v844_v13 = vrot.slane %v843_v61, 2 }
 0x134   : > { %v797_v19 = vrot.slane %v796_v62, 1  ;;  %v804_v2 = vrot.slane %v803_v63, 1  ;;  %v811_v6 = vrot.slane %v810_v8, 1  ;;  %v818_v20 = vrot.slane %v817_v58, 1 }
 0x135   : > { %v824_v0 = vadd.f32 %v823_v11, %v822_v55  ;;  %v831_v9 = vadd.f32 %v830_v16, %v829_v57  ;;  %v838_v21 = vadd.f32 %v837_v12, %v836_v1  ;;  %v845_v26 = vadd.f32 %v844_v13, %v843_v61 }
 0x136   : > { %v798_v17 = vadd.f32 %v797_v19, %v796_v62  ;;  %v805_v27 = vadd.f32 %v804_v2, %v803_v63  ;;  %v812_v23 = vadd.f32 %v811_v6, %v810_v8  ;;  %v819_v28 = vadd.f32 %v818_v20, %v817_v58 }
 0x137   : > { %v825_v29 = vrot.slane %v824_v0, 1  ;;  %v832_v35 = vrot.slane %v831_v9, 1  ;;  %v839_v31 = vrot.slane %v838_v21, 1  ;;  %v846_v32 = vrot.slane %v845_v26, 1 }
 0x138   : > { %v1024_v37 = vsel %vm620_vm2, %v805_v27, %v798_v17  ;;  %v776_v57 = vmul.f32 %v2672_v3, %v2508_v48  ;;  %v777_v1 = vmul.f32 %v2672_v3, %v2505_v47  ;;  %v778_v61 = vmul.f32 %v2672_v3, %v2520_v54 }
 0x139   : > { %v826_v38 = vadd.f32 %v825_v29, %v824_v0  ;;  %v833_v40 = vadd.f32 %v832_v35, %v831_v9  ;;  %v840_v45 = vadd.f32 %v839_v31, %v838_v21  ;;  %v1025_v46 = vsel %vm622_vm3, %v812_v23, %v1024_v37 }
 0x13a   : > { %v847_v39 = vadd.f32 %v846_v32, %v845_v26  ;;  %v1026_v49 = vsel %vm624_vm4, %v819_v28, %v1025_v46  ;;  %v779_v62 = vmul.f32 %v2672_v3, %v2529_v59  ;;  %v780_v63 = vmul.f32 %v2672_v3, %v2541_v4 }
 0x13b   : > { %v1027_v50 = vsel %vm626_vm5, %v826_v38, %v1026_v49  ;;  %v781_v8 = vmul.f32 %v2672_v3, %v2553_v14  ;;  %v782_v48 = vmul.f32 %v2672_v3, %v2565_v22  ;;  %v783_v47 = vmul.f32 %v2672_v3, %v2577_v33 }
 0x13c   : > { %v1028_v51 = vsel %vm628_vm6, %v833_v40, %v1027_v50  ;;  %v904_v54 = vsel %vm361_vm0, %v776_v57, 0.0  ;;  %v911_v59 = vsel %vm361_vm0, %v777_v1, 0.0  ;;  %v918_v58 = vsel %vm361_vm0, %v778_v61, 0.0 }
 0x13d   : > { %v1029_v52 = vsel %vm630_vm7, %v840_v45, %v1028_v51  ;;  %v905_v4 = vrot.slane %v904_v54, 4  ;;  %v912_v14 = vrot.slane %v911_v59, 4  ;;  %v919_v11 = vrot.slane %v918_v58, 4 }
 0x13e   : > { %v1030_v55 = vsel %vm632_vm8, %v847_v39, %v1029_v52  ;;  %v925_v16 = vsel %vm361_vm0, %v779_v62, 0.0  ;;  %v932_v12 = vsel %vm361_vm0, %v780_v63, 0.0  ;;  %v939_v22 = vsel %vm361_vm0, %v781_v8, 0.0 }
 0x13f   : > { %1947 = vmatpush3.xpose.msk.msra.mxu1 %vm1031_vm10, %v1030_v55  ;;  %v906_v13 = vadd.f32 %v905_v4, %v904_v54  ;;  %v913_v33 = vadd.f32 %v912_v14, %v911_v59  ;;  %v920_v19 = vadd.f32 %v919_v11, %v918_v58  ;;  %v926_v2 = vrot.slane %v925_v16, 4 }
 0x140   : > { %1951 = vmatprep.subr.mxu1 %v2215_v56  ;;  %v933_v6 = vrot.slane %v932_v12, 4  ;;  %v940_v20 = vrot.slane %v939_v22, 4  ;;  %v946_v0 = vsel %vm361_vm0, %v782_v48, 0.0  ;;  %v953_v9 = vsel %vm361_vm0, %v783_v47, 0.0 }
 0x141   : > { %v907_v21 = vrot.slane %v906_v13, 2  ;;  %v914_v26 = vrot.slane %v913_v33, 2  ;;  %v921_v17 = vrot.slane %v920_v19, 2  ;;  %v927_v27 = vadd.f32 %v926_v2, %v925_v16 }
 0x142   : > { %v934_v23 = vadd.f32 %v933_v6, %v932_v12  ;;  %v941_v28 = vadd.f32 %v940_v20, %v939_v22  ;;  %v947_v29 = vrot.slane %v946_v0, 4  ;;  %v954_v35 = vrot.slane %v953_v9, 4 }
 0x143   : > { %v908_v31 = vadd.f32 %v907_v21, %v906_v13  ;;  %v915_v32 = vadd.f32 %v914_v26, %v913_v33  ;;  %v922_v37 = vadd.f32 %v921_v17, %v920_v19  ;;  %v928_v38 = vrot.slane %v927_v27, 2 }
 0x144   : > { %v935_v40 = vrot.slane %v934_v23, 2  ;;  %v942_v45 = vrot.slane %v941_v28, 2  ;;  %v948_v46 = vadd.f32 %v947_v29, %v946_v0  ;;  %v955_v39 = vadd.f32 %v954_v35, %v953_v9 }
 0x145   : > { %v909_v49 = vrot.slane %v908_v31, 1  ;;  %v916_v50 = vrot.slane %v915_v32, 1  ;;  %v923_v51 = vrot.slane %v922_v37, 1  ;;  %v929_v52 = vadd.f32 %v928_v38, %v927_v27 }
 0x146   : > { %v936_v55 = vadd.f32 %v935_v40, %v934_v23  ;;  %v943_v57 = vadd.f32 %v942_v45, %v941_v28  ;;  %v949_v1 = vrot.slane %v948_v46, 2  ;;  %v956_v61 = vrot.slane %v955_v39, 2 }
 0x147   : > { %v910_v62 = vadd.f32 %v909_v49, %v908_v31  ;;  %v917_v63 = vadd.f32 %v916_v50, %v915_v32  ;;  %v924_v8 = vadd.f32 %v923_v51, %v922_v37  ;;  %v930_v48 = vrot.slane %v929_v52, 1 }
 0x148   : > { %v937_v47 = vrot.slane %v936_v55, 1  ;;  %v944_v54 = vrot.slane %v943_v57, 1  ;;  %v950_v59 = vadd.f32 %v949_v1, %v948_v46  ;;  %v957_v58 = vadd.f32 %v956_v61, %v955_v39 }
 0x149   : > { %v931_v4 = vadd.f32 %v930_v48, %v929_v52  ;;  %v1205_v14 = vsel %vm620_vm2, %v917_v63, %v910_v62  ;;  %v768_v21 = vmul.f32 %v2672_v3, %v2421_v5  ;;  %v769_v26 = vmul.f32 %v2672_v3, %v2434_v10 }
 0x14a   : > { %v938_v11 = vadd.f32 %v937_v47, %v936_v55  ;;  %v945_v16 = vadd.f32 %v944_v54, %v943_v57  ;;  %v951_v12 = vrot.slane %v950_v59, 1  ;;  %v958_v22 = vrot.slane %v957_v58, 1 }
 0x14b   : > { %v1206_v13 = vsel %vm622_vm3, %v924_v8, %v1205_v14  ;;  %v770_v17 = vmul.f32 %v2672_v3, %v2448_v18  ;;  %v848_v27 = vsel %vm361_vm0, %v768_v21, 0.0  ;;  %v855_v23 = vsel %vm361_vm0, %v769_v26, 0.0 }
 0x14c   : > { %v952_v33 = vadd.f32 %v951_v12, %v950_v59  ;;  %v959_v19 = vadd.f32 %v958_v22, %v957_v58  ;;  %v1207_v2 = vsel %vm624_vm4, %v931_v4, %v1206_v13  ;;  %v784_v28 = vmul.f32 %v2672_v3, %v2517_v53 }
 0x14d   : > { %v1208_v6 = vsel %vm626_vm5, %v938_v11, %v1207_v2  ;;  %v785_v29 = vmul.f32 %v2672_v3, %v2532_v60  ;;  %v771_v35 = vmul.f32 %v2672_v3, %v2460_v24  ;;  %v849_v5 = vrot.slane %v848_v27, 4 }
 0x14e   : > { %v1209_v20 = vsel %vm628_vm6, %v945_v16, %v1208_v6  ;;  %v856_v31 = vrot.slane %v855_v23, 4  ;;  %v862_v10 = vsel %vm361_vm0, %v770_v17, 0.0  ;;  %v786_v18 = vmul.f32 %v2672_v3, %v2544_v7 }
 0x14f   : > { %v1210_v0 = vsel %vm630_vm7, %v952_v33, %v1209_v20  ;;  %v960_v32 = vsel %vm361_vm0, %v784_v28, 0.0  ;;  %v967_v37 = vsel %vm361_vm0, %v785_v29, 0.0  ;;  %v772_v53 = vmul.f32 %v2672_v3, %v2472_v30 }
 0x150   : > { %v1211_v9 = vsel %vm632_vm8, %v959_v19, %v1210_v0  ;;  %v773_v60 = vmul.f32 %v2672_v3, %v2484_v36  ;;  %v863_v38 = vrot.slane %v862_v10, 4  ;;  %v869_v24 = vsel %vm361_vm0, %v771_v35, 0.0 }
 0x151   : > { %1957 = vmatpush3.xpose.msk.msra.mxu0 %vm1031_vm10, %v1211_v9  ;;  %v850_v40 = vadd.f32 %v849_v5, %v848_v27  ;;  %v857_v45 = vadd.f32 %v856_v31, %v855_v23  ;;  %v787_v46 = vmul.f32 %v2672_v3, %v2556_v15  ;;  %v961_v39 = vrot.slane %v960_v32, 4 }
 0x152   : > { %1966 = vmatprep.subr.mxu0 %v2215_v56  ;;  %v968_v7 = vrot.slane %v967_v37, 4  ;;  %v974_v49 = vsel %vm361_vm0, %v786_v18, 0.0  ;;  %v774_v50 = vmul.f32 %v2672_v3, %v2496_v42  ;;  %v870_v51 = vrot.slane %v869_v24, 4 }
 0x153   : > { %v864_v30 = vadd.f32 %v863_v38, %v862_v10  ;;  %v876_v52 = vsel %vm361_vm0, %v772_v53, 0.0  ;;  %v883_v36 = vsel %vm361_vm0, %v773_v60, 0.0  ;;  %v788_v55 = vmul.f32 %v2672_v3, %v2568_v25 }
 0x154   : > { %v851_v57 = vrot.slane %v850_v40, 2  ;;  %v858_v1 = vrot.slane %v857_v45, 2  ;;  %v975_v61 = vrot.slane %v974_v49, 4  ;;  %v981_v15 = vsel %vm361_vm0, %v787_v46, 0.0 }
 0x155   : > { %v775_v62 = vmul.f32 %v2672_v3, %v2493_v41  ;;  %v962_v63 = vadd.f32 %v961_v39, %v960_v32  ;;  %v969_v8 = vadd.f32 %v968_v7, %v967_v37  ;;  %v871_v42 = vadd.f32 %v870_v51, %v869_v24 }
 0x156   : > { %v877_v48 = vrot.slane %v876_v52, 4  ;;  %v789_v47 = vmul.f32 %v2672_v3, %v2580_v34  ;;  %v865_v54 = vrot.slane %v864_v30, 2  ;;  %v884_v59 = vrot.slane %v883_v36, 4 }
 0x157   : > { %v982_v58 = vrot.slane %v981_v15, 4  ;;  %v988_v25 = vsel %vm361_vm0, %v788_v55, 0.0  ;;  %v852_v4 = vadd.f32 %v851_v57, %v850_v40  ;;  %v859_v14 = vadd.f32 %v858_v1, %v857_v45 }
 0x158   : > { %v890_v11 = vsel %vm361_vm0, %v774_v50, 0.0  ;;  %v976_v16 = vadd.f32 %v975_v61, %v974_v49  ;;  %v897_v12 = vsel %vm361_vm0, %v775_v62, 0.0  ;;  %v790_v41 = vmul.f32 %v2672_v3, %v2589_v43 }
 0x159   : > { %v963_v22 = vrot.slane %v962_v63, 2  ;;  %v970_v13 = vrot.slane %v969_v8, 2  ;;  %v872_v33 = vrot.slane %v871_v42, 2  ;;  %v878_v19 = vadd.f32 %v877_v48, %v876_v52 }
 0x15a   : > { %v989_v34 = vrot.slane %v988_v25, 4  ;;  %v995_v2 = vsel %vm361_vm0, %v789_v47, 0.0  ;;  %v866_v6 = vadd.f32 %v865_v54, %v864_v30  ;;  %v885_v20 = vadd.f32 %v884_v59, %v883_v36 }
 0x15b   : > { %v891_v0 = vrot.slane %v890_v11, 4  ;;  %v983_v9 = vadd.f32 %v982_v58, %v981_v15  ;;  %v853_v21 = vrot.slane %v852_v4, 1  ;;  %v860_v26 = vrot.slane %v859_v14, 1 }
 0x15c   : > { %v791_v17 = vmul.f32 %v2672_v3, %v2592_v44  ;;  %v977_v27 = vrot.slane %v976_v16, 2  ;;  %v964_v23 = vadd.f32 %v963_v22, %v962_v63  ;;  %v971_v28 = vadd.f32 %v970_v13, %v969_v8 }
 0x15d   : > { %v996_v43 = vrot.slane %v995_v2, 4  ;;  %v1002_v29 = vsel %vm361_vm0, %v790_v41, 0.0  ;;  %v873_v35 = vadd.f32 %v872_v33, %v871_v42  ;;  %v879_v5 = vrot.slane %v878_v19, 2 }
 0x15e   : > { %v898_v31 = vrot.slane %v897_v12, 4  ;;  %v990_v10 = vadd.f32 %v989_v34, %v988_v25  ;;  %v867_v18 = vrot.slane %v866_v6, 1  ;;  %v886_v32 = vrot.slane %v885_v20, 2 }
 0x15f   : > { %v892_v37 = vadd.f32 %v891_v0, %v890_v11  ;;  %v984_v53 = vrot.slane %v983_v9, 2  ;;  %v854_v60 = vadd.f32 %v853_v21, %v852_v4  ;;  %v978_v38 = vadd.f32 %v977_v27, %v976_v16 }
 0x160   : > { %v1003_v24 = vrot.slane %v1002_v29, 4  ;;  %v1009_v40 = vsel %vm361_vm0, %v791_v17, 0.0  ;;  %v861_v44 = vadd.f32 %v860_v26, %v859_v14  ;;  %v965_v3 = vrot.slane %v964_v23, 1 }
 0x161   : > { %v972_v45 = vrot.slane %v971_v28, 1  ;;  %v997_v46 = vadd.f32 %v996_v43, %v995_v2  ;;  %v880_v39 = vadd.f32 %v879_v5, %v878_v19  ;;  %v899_v7 = vadd.f32 %v898_v31, %v897_v12 }
 0x162   : > { %v991_v49 = vrot.slane %v990_v10, 2  ;;  %v868_v50 = vadd.f32 %v867_v18, %v866_v6  ;;  %v874_v51 = vrot.slane %v873_v35, 1  ;;  %v985_v30 = vadd.f32 %v984_v53, %v983_v9 }
 0x163   : > { %v1010_v52 = vrot.slane %v1009_v40, 4  ;;  %v887_v36 = vadd.f32 %v886_v32, %v885_v20  ;;  %v893_v55 = vrot.slane %v892_v37, 2  ;;  %v979_v57 = vrot.slane %v978_v38, 1 }
 0x164   : > { %v1004_v1 = vadd.f32 %v1003_v24, %v1002_v29  ;;  %v1115_v61 = vsel %vm620_vm2, %v861_v44, %v854_v60  ;;  %v966_v15 = vadd.f32 %v965_v3, %v964_v23  ;;  %v973_v62 = vadd.f32 %v972_v45, %v971_v28 }
 0x165   : > { %v998_v63 = vrot.slane %v997_v46, 2  ;;  %v881_v8 = vrot.slane %v880_v39, 1  ;;  %v992_v42 = vadd.f32 %v991_v49, %v990_v10  ;;  %v875_v48 = vadd.f32 %v874_v51, %v873_v35 }
 0x166   : > { %v900_v47 = vrot.slane %v899_v7, 2  ;;  %v986_v54 = vrot.slane %v985_v30, 1  ;;  %v1011_v59 = vadd.f32 %v1010_v52, %v1009_v40  ;;  %v894_v58 = vadd.f32 %v893_v55, %v892_v37 }
 0x167   : > { %v1116_v25 = vsel %vm622_vm3, %v868_v50, %v1115_v61  ;;  %v980_v4 = vadd.f32 %v979_v57, %v978_v38  ;;  %v1005_v14 = vrot.slane %v1004_v1, 2  ;;  %v888_v11 = vrot.slane %v887_v36, 1 }
 0x168   : > { %v999_v16 = vadd.f32 %v998_v63, %v997_v46  ;;  %v1295_v12 = vsel %vm620_vm2, %v973_v62, %v966_v15  ;;  %v882_v41 = vadd.f32 %v881_v8, %v880_v39  ;;  %v993_v22 = vrot.slane %v992_v42, 1  ;;  %v321_v46 = vld [vmem:[%s2913_s4] sm:$0xff] }
 0x169   : > { %v901_v13 = vadd.f32 %v900_v47, %v899_v7  ;;  %v1117_v33 = vsel %vm624_vm4, %v875_v48, %v1116_v25  ;;  %v987_v19 = vadd.f32 %v986_v54, %v985_v30  ;;  %v1012_v34 = vrot.slane %v1011_v59, 2  ;;  %v322_v15 = vld [vmem:[%s2914_s5] sm:$0xff] }
 0x16a   : > { %v895_v2 = vrot.slane %v894_v58, 1  ;;  %v1006_v6 = vadd.f32 %v1005_v14, %v1004_v1  ;;  %v1296_v20 = vsel %vm622_vm3, %v980_v4, %v1295_v12  ;;  %v889_v0 = vadd.f32 %v888_v11, %v887_v36 }
 0x16b   : > { %v1000_v9 = vrot.slane %v999_v16, 1  ;;  %v1118_v21 = vsel %vm626_vm5, %v882_v41, %v1117_v33  ;;  %v994_v26 = vadd.f32 %v993_v22, %v992_v42  ;;  %v902_v17 = vrot.slane %v901_v13, 1 }
 0x16c   : > { %v1013_v27 = vadd.f32 %v1012_v34, %v1011_v59  ;;  %v1297_v23 = vsel %vm624_vm4, %v987_v19, %v1296_v20  ;;  %v896_v28 = vadd.f32 %v895_v2, %v894_v58  ;;  %v1007_v43 = vrot.slane %v1006_v6, 1 }
 0x16d   : > { %v1119_v29 = vsel %vm628_vm6, %v889_v0, %v1118_v21  ;;  %v1001_v35 = vadd.f32 %v1000_v9, %v999_v16  ;;  %v1298_v5 = vsel %vm626_vm5, %v994_v26, %v1297_v23  ;;  %v903_v31 = vadd.f32 %v902_v17, %v901_v13 }
 0x16e   : > { %v1014_v10 = vrot.slane %v1013_v27, 1  ;;  %v1120_v18 = vsel %vm630_vm7, %v896_v28, %v1119_v29  ;;  %v1008_v32 = vadd.f32 %v1007_v43, %v1006_v6 }
 0x16f   : > { %v1299_v37 = vsel %vm628_vm6, %v1001_v35, %v1298_v5  ;;  %v1121_v60 = vsel %vm632_vm8, %v903_v31, %v1120_v18 }
 0x170   : > { %v1015_v38 = vadd.f32 %v1014_v10, %v1013_v27  ;;  %v1300_v40 = vsel %vm630_vm7, %v1008_v32, %v1299_v37 }
 0x172   : > { %v1301_v44 = vsel %vm632_vm8, %v1015_v38, %v1300_v40 }
 0x1dc   : > { %v1942_v53 = vpop.f32.mrb[0].mxu0 }
 0x1dd   : > { %v734_v24 = vpop.f32.mrb[1].mxu0 }
 0x1de   : > { %1949 = vmatmul.mubr.msk.f32.vlgmr.msra.gmra.mrb[0].mxu1 %vm1031_vm10, %v734_v24 }
 0x1df   : > { %1952 = vmatpush3.xpose.msk.msra.mxu1 %vm1031_vm10, %v1121_v60  ;;  %1953 = vmatprep.mubr.msk.f32.mxu1 %vm2216_vm11, %v2215_v56 }
 0x1e0   : > { %1961 = vmatprep.subr.mxu1 %v2215_v56 }
 0x1e2   : > { %1954 = vmatmul.mubr.msk.f32.vlgmr.msra.gmra.mrb[2].mxu1 %vm1031_vm10, %v1942_v53 }
 0x1e3   : > { %1962 = vmatpush3.xpose.msk.msra.mxu1 %vm1031_vm10, %v1301_v44  ;;  %1963 = vmatprep.mubr.msk.f32.mxu1 %vm2216_vm11, %v2215_v56 }
 0x1e4   : > { %1971 = vmatprep.subr.mxu1 %v2215_v56 }
 0x1fc   : > { %v1945_v3 = vpop.f32.mrb[2].mxu0 }
 0x1fd   : > { %v744_v45 = vpop.f32.mrb[3].mxu0  ;;  %1964 = vmatmul.mubr.msk.f32.vlgmr.msra.gmra.mrb[4].mxu1 %vm1031_vm10, %v1945_v3 }
 0x1fe   : > { %1959 = vmatmul.mubr.msk.f32.vlgmr.msra.gmra.mrb[4].mxu0 %vm1031_vm10, %v744_v45  ;;  %1973 = vmatprep.mubr.msk.f32.mxu1 %vm2216_vm11, %v2215_v56 }
 0x1ff   : > { %1968 = vmatprep.mubr.msk.f32.mxu0 %vm2216_vm11, %v2215_v56 }
 0x2b1   : > { %v1103_v39 = vpop.f32.mrb[0].mxu1 }
 0x2b2   : > { %v1104_v7 = vadd.f32 %v1103_v39, %v321_v46  ;;  %v1950_v49 = vpop.f32.mrb[1].mxu1 }
 0x2b4   : > { %v1901_v50 = vmul.f32 -1.442695, %v1104_v7 }
 0x2b5   : > { %v1193_v51 = vpop.f32.mrb[2].mxu1 }
 0x2b6   : > { %2049 = vpow2.f32 %v1901_v50  ;;  %v1194_v30 = vadd.f32 %v1193_v51, %v321_v46  ;;  %v1955_v52 = vpop.f32.mrb[3].mxu1 }
 0x2b8   : > { %v1902_v36 = vmul.f32 -1.442695, %v1194_v30 }
 0x2ba   : > { %2051 = vpow2.f32 %v1902_v36 }
 0x2c0   : > { %v2050_v55 = vpop.eup %2049 }
 0x2c1   : > { %v1389_v57 = vadd.f32 1.0, %v2050_v55 }
 0x2c3   : > { %2053 = vrcp.f32 %v1389_v57 }
 0x2c4   : > { %v2052_v1 = vpop.eup %2051 }
 0x2c5   : > { %v1390_v61 = vadd.f32 1.0, %v2052_v1 }
 0x2c7   : > { %2055 = vrcp.f32 %v1390_v61 }
 0x2cd   : > { %v2054_v62 = vpop.eup %2053 }
 0x2ce   : > { %1967 = vmatpush3.msra.mxu0 %v2054_v62 }
 0x2cf   : > { %1969 = vmatmul.mubr.msk.f32.vlgmr.msra.gmra.mrb[6].mxu0 %vm1401_vm12, %v322_v15  ;;  %1976 = vmatprep.subr.mxu0 %v2215_v56 }
 0x2d0   : > { %v1373_v63 = vpop.f32.mrb[4].mxu1  ;;  %1978 = vmatprep.mubr.msk.f32.mxu0 %vm2216_vm11, %v2215_v56 }
 0x2d1   : > { %v2056_v8 = vpop.eup %2055  ;;  %v1374_v42 = vadd.f32 %v1373_v63, %v321_v46  ;;  %v1283_v48 = vpop.f32.mrb[4].mxu0 }
 0x2d2   : > { %v1965_v47 = vpop.f32.mrb[5].mxu1  ;;  %v1284_v54 = vadd.f32 %v1283_v48, %v321_v46  ;;  %v1960_v59 = vpop.f32.mrb[5].mxu0  ;;  %1972 = vmatpush3.msra.mxu1 %v2056_v8 }
 0x2d3   : > { %v1904_v58 = vmul.f32 -1.442695, %v1374_v42  ;;  %1974 = vmatmul.mubr.msk.f32.vlgmr.msra.gmra.mrb[6].mxu1 %vm1401_vm12, %v322_v15  ;;  %1981 = vmatprep.subr.mxu1 %v2215_v56 }
 0x2d4   : > { %v1903_v25 = vmul.f32 -1.442695, %v1284_v54  ;;  %1983 = vmatprep.mubr.msk.f32.mxu1 %vm2216_vm11, %v2215_v56 }
 0x2d5   : > { %2057 = vpow2.f32 %v1904_v58 }
 0x2d6   : > { %2059 = vpow2.f32 %v1903_v25 }
 0x2df   : > { %v2058_v4 = vpop.eup %2057 }
 0x2e0   : > { %v2060_v14 = vpop.eup %2059  ;;  %v1392_v11 = vadd.f32 1.0, %v2058_v4 }
 0x2e1   : > { %v1391_v16 = vadd.f32 1.0, %v2060_v14 }
 0x2e2   : > { %2061 = vrcp.f32 %v1392_v11 }
 0x2e3   : > { %2063 = vrcp.f32 %v1391_v16 }
 0x2ec   : > { %v2062_v12 = vpop.eup %2061 }
 0x2ed   : > { %v2064_v41 = vpop.eup %2063  ;;  %1982 = vmatpush3.msra.mxu1 %v2062_v12 }
 0x2ee   : > { %1977 = vmatpush3.msra.mxu0 %v2064_v41  ;;  %1984 = vmatmul.mubr.msk.f32.vlgmr.msra.gmra.mrb[8].mxu1 %vm1401_vm12, %v322_v15 }
 0x2ef   : > { %1979 = vmatmul.mubr.msk.f32.vlgmr.msra.gmra.mrb[8].mxu0 %vm1401_vm12, %v322_v15 }
 0x3a2   : > { %v1471_v22 = vpop.f32.mrb[6].mxu0 }
 0x3a3   : > { %v1685_v13 = vsel %vm1401_vm12, %v1471_v22, -inf  ;;  %v1970_v56 = vpop.f32.mrb[7].mxu0 }
 0x3a4   : > { %v1686_v33 = vrot.slane %v1685_v13, 4 }
 0x3a6   : > { %v1687_v19 = vmax.f32 %v1685_v13, %v1686_v33  ;;  %v1541_v34 = vpop.f32.mrb[6].mxu1 }
 0x3a7   : > { %v1692_v2 = vsel %vm1401_vm12, %v1541_v34, -inf  ;;  %v1975_v6 = vpop.f32.mrb[7].mxu1 }
 0x3a8   : > { %v1688_v20 = vrot.slane %v1687_v19, 2  ;;  %v1693_v0 = vrot.slane %v1692_v2, 4 }
 0x3aa   : > { %v1689_v9 = vmax.f32 %v1687_v19, %v1688_v20  ;;  %v1694_v21 = vmax.f32 %v1692_v2, %v1693_v0 }
 0x3ac   : > { %v1690_v26 = vrot.slane %v1689_v9, 1  ;;  %v1695_v17 = vrot.slane %v1694_v21, 2 }
 0x3ae   : > { %v1691_v27 = vmax.f32 %v1689_v9, %v1690_v26  ;;  %v1696_v23 = vmax.f32 %v1694_v21, %v1695_v17 }
 0x3b0   : > { %v1713_v28 = vsub.f32 %v1471_v22, %v1691_v27  ;;  %v1697_v43 = vrot.slane %v1696_v23, 1 }
 0x3b2   : > { %v1717_v29 = vmul.f32 1.442695, %v1713_v28  ;;  %v1698_v35 = vmax.f32 %v1696_v23, %v1697_v43 }
 0x3b4   : > { %2065 = vpow2.f32 %v1717_v29  ;;  %v1714_v5 = vsub.f32 %v1541_v34, %v1698_v35 }
 0x3b6   : > { %v1719_v31 = vmul.f32 1.442695, %v1714_v5 }
 0x3b8   : > { %2067 = vpow2.f32 %v1719_v31 }
 0x3be   : > { %v2066_v10 = vpop.eup %2065 }
 0x3bf   : > { %v1725_v18 = vsel %vm1401_vm12, %v2066_v10, 0.0 }
 0x3c0   : > { %v1726_v32 = vrot.slane %v1725_v18, 4 }
 0x3c1   : > { %v1681_v37 = vpop.f32.mrb[8].mxu1 }
 0x3c2   : > { %v2068_v53 = vpop.eup %2067  ;;  %v1727_v60 = vadd.f32 %v1726_v32, %v1725_v18  ;;  %v1706_v38 = vsel %vm1401_vm12, %v1681_v37, -inf  ;;  %v1611_v24 = vpop.f32.mrb[8].mxu0 }
 0x3c3   : > { %v1985_v40 = vpop.f32.mrb[9].mxu1  ;;  %v1732_v44 = vsel %vm1401_vm12, %v2068_v53, 0.0  ;;  %v1707_v3 = vrot.slane %v1706_v38, 4  ;;  %v1699_v45 = vsel %vm1401_vm12, %v1611_v24, -inf  ;;  %v1980_v46 = vpop.f32.mrb[9].mxu0 }
 0x3c4   : > { %v1728_v39 = vrot.slane %v1727_v60, 2  ;;  %v1733_v7 = vrot.slane %v1732_v44, 4  ;;  %v1700_v49 = vrot.slane %v1699_v45, 4 }
 0x3c5   : > { %v1708_v50 = vmax.f32 %v1706_v38, %v1707_v3 }
 0x3c6   : > { %v1729_v51 = vadd.f32 %v1728_v39, %v1727_v60  ;;  %v1734_v30 = vadd.f32 %v1733_v7, %v1732_v44  ;;  %v1701_v52 = vmax.f32 %v1699_v45, %v1700_v49 }
 0x3c7   : > { %v1709_v36 = vrot.slane %v1708_v50, 2 }
 0x3c8   : > { %v1730_v55 = vrot.slane %v1729_v51, 1  ;;  %v1735_v57 = vrot.slane %v1734_v30, 2  ;;  %v1702_v1 = vrot.slane %v1701_v52, 2 }
 0x3c9   : > { %v1710_v61 = vmax.f32 %v1708_v50, %v1709_v36 }
 0x3ca   : > { %v1731_v15 = vadd.f32 %v1730_v55, %v1729_v51  ;;  %v1736_v62 = vadd.f32 %v1735_v57, %v1734_v30  ;;  %v1703_v63 = vmax.f32 %v1701_v52, %v1702_v1 }
 0x3cb   : > { %v1711_v8 = vrot.slane %v1710_v61, 1 }
 0x3cc   : > { %2069 = vrcp.f32 %v1731_v15  ;;  %v1737_v42 = vrot.slane %v1736_v62, 1  ;;  %v1704_v48 = vrot.slane %v1703_v63, 1 }
 0x3cd   : > { %v1712_v47 = vmax.f32 %v1710_v61, %v1711_v8 }
 0x3ce   : > { %v1738_v54 = vadd.f32 %v1737_v42, %v1736_v62  ;;  %v1705_v59 = vmax.f32 %v1703_v63, %v1704_v48 }
 0x3cf   : > { %v1716_v58 = vsub.f32 %v1681_v37, %v1712_v47 }
 0x3d0   : > { %2071 = vrcp.f32 %v1738_v54  ;;  %v1715_v25 = vsub.f32 %v1611_v24, %v1705_v59 }
 0x3d1   : > { %v1723_v4 = vmul.f32 1.442695, %v1716_v58 }
 0x3d2   : > { %v1721_v14 = vmul.f32 1.442695, %v1715_v25 }
 0x3d3   : > { %2073 = vpow2.f32 %v1723_v4 }
 0x3d4   : > { %2075 = vpow2.f32 %v1721_v14 }
 0x3d6   : > { %v2070_v11 = vpop.eup %2069 }
 0x3d7   : > { %v1757_v16 = vmul.f32 %v2070_v11, %v1731_v15 }
 0x3d9   : > { %v1761_v12 = vsub.f32 2.0, %v1757_v16 }
 0x3da   : > { %v2072_v41 = vpop.eup %2071 }
 0x3db   : > { %v1765_v22 = vmul.f32 %v2070_v11, %v1761_v12  ;;  %v1758_v13 = vmul.f32 %v2072_v41, %v1738_v54 }
 0x3dd   : > { %v2074_v56 = vpop.eup %2073  ;;  %v1769_v33 = vmul.f32 %v2066_v10, %v1765_v22  ;;  %v1762_v19 = vsub.f32 2.0, %v1758_v13 }
 0x3de   : > { %v2076_v34 = vpop.eup %2075  ;;  %v1746_v2 = vsel %vm1401_vm12, %v2074_v56, 0.0 }
 0x3df   : > { %1773 = vst.msk [vmem:[%s2847_s12] sm:$0xff] %vm1401_vm12, %v1769_v33  ;;  %v1766_v6 = vmul.f32 %v2072_v41, %v1762_v19  ;;  %v1747_v20 = vrot.slane %v1746_v2, 4  ;;  %v1739_v0 = vsel %vm1401_vm12, %v2076_v34, 0.0 }
 0x3e0   : > { %v1740_v9 = vrot.slane %v1739_v0, 4 }
 0x3e1   : > { %v1770_v21 = vmul.f32 %v2068_v53, %v1766_v6  ;;  %v1748_v26 = vadd.f32 %v1747_v20, %v1746_v2 }
 0x3e2   : > { %v1741_v17 = vadd.f32 %v1740_v9, %v1739_v0 }
 0x3e3   : > { %1774 = vst.msk [vmem:[%s2847_s12 + $0x8] sm:$0xff] %vm1401_vm12, %v1770_v21  ;;  %v1749_v27 = vrot.slane %v1748_v26, 2 }
 0x3e4   : > { %v1742_v23 = vrot.slane %v1741_v17, 2 }
 0x3e5   : > { %v1750_v28 = vadd.f32 %v1749_v27, %v1748_v26 }
 0x3e6   : > { %v1743_v43 = vadd.f32 %v1742_v23, %v1741_v17 }
 0x3e7   : > { %v1751_v29 = vrot.slane %v1750_v28, 1 }
 0x3e8   : > { %v1744_v35 = vrot.slane %v1743_v43, 1 }
 0x3e9   : > { %v1752_v5 = vadd.f32 %v1751_v29, %v1750_v28 }
 0x3ea   : > { %v1745_v31 = vadd.f32 %v1744_v35, %v1743_v43 }
 0x3eb   : > { %2077 = vrcp.f32 %v1752_v5 }
 0x3ec   : > { %2079 = vrcp.f32 %v1745_v31 }
 0x3f5   : > { %v2078_v10 = vpop.eup %2077 }
 0x3f6   : > { %v2080_v18 = vpop.eup %2079  ;;  %v1760_v32 = vmul.f32 %v2078_v10, %v1752_v5 }
 0x3f7   : > { %v1759_v37 = vmul.f32 %v2080_v18, %v1745_v31 }
 0x3f8   : > { %v1764_v53 = vsub.f32 2.0, %v1760_v32 }
 0x3f9   : > { %v1763_v60 = vsub.f32 2.0, %v1759_v37 }
 0x3fa   : > { %v1768_v38 = vmul.f32 %v2078_v10, %v1764_v53 }
 0x3fb   : > { %v1767_v24 = vmul.f32 %v2080_v18, %v1763_v60 }
 0x3fc   : > { %v1772_v40 = vmul.f32 %v2074_v56, %v1768_v38 }
 0x3fd   : > { %v1771_v44 = vmul.f32 %v2076_v34, %v1767_v24 }
 0x3fe   : > { %1776 = vst.msk [vmem:[%s2847_s12 + $0x18] sm:$0xff] %vm1401_vm12, %v1772_v40 }
 0x3ff   : > { %1775 = vst.msk [vmem:[%s2847_s12 + $0x10] sm:$0xff] %vm1401_vm12, %v1771_v44 }
 0x400   : > { %2152 = shalt.err (!%p2149_p13)
}
 0x401   : > { %s2153_s28 = scalar_lea.hbm %s2859_s20, 512  ;;  %s2157_s26 = scalar_lea.hbm %s2915_s6, 1024 }
 0x402   : > { %p2154_p7 = scmp.ne.s32.totalorder %s2859_s20, %s2153_s28  ;;  %p2158_p1 = scmp.lt.u32.totalorder %s2859_s20, %s2915_s6 }
 0x403   : > { %p2159_p11 = scmp.lt.u32.totalorder %s2157_s26, %s2153_s28  ;;  %p2161_p9 = scmp.lt.u32.totalorder %s2153_s28, %s2859_s20 }
 0x404   : > { %p2155_p3 = pnand %p2154_p7, %p2935_p10 }
 0x405   : > { %p2160_p8 = por %p2159_p11, %p2158_p1 }
 0x406   : > { %p2156_p12 = pneg %p2155_p3 }
 0x407   : > { %p2162_p2 = por %p2161_p9, %p2160_p8 }
 0x409   : > { %p2163_p4 = pnand %p2162_p2, %p2156_p12 }
 0x40b   : > { %2166 = shalt.err (!%p2163_p4)
}
 0x40c   : > { %s2218_s7 = smov 128   ;;  %s2219_s18 = smov 8  }
 0x40d   : > { %1992 = dma.vmem_to_hbm [thread:$0]  (%p2935_p10), %s2861_s13, 512, %s2859_s20, %s1778_s25, %s2218_s7, %s2218_s7, %s2219_s18  }
 0x40e PF: > { %s1806_s19 = sand.u32 1, %s2197_s21   ;;  %p2936_p5 = scmp.ne.s32.totalorder %s2925_s10, 0 }
 0x40f   : > { %p2937_p0 = scmp.ge.s32.totalorder %s2209_s24, 2  ;;  %s1807_s30 = scalar_lea.sflag [#allocation4], %s1806_s19 }
 0x411   : > { %p2003_p6 = pnand %p2937_p0, %p2936_p5 }
 0x413   : > { %2192 = dma.done.wait (!%p2003_p6), %s1807_s30, 512  }
 0x414   : > { %2194 = vsyncadd (!%p2003_p6), %s1807_s30, 4294966784  ;;  %s2938_s11 = sld [smem:[#allocation11_spill]]  ;;  %p20_p13 = scmp.ge.s32.totalorder %s2280_s27, 4  }
 0x415   : > { %s2939_s21 = smov %s2201_s22  ;;  %s2940_s22 = smov %s2205_s23 }
 0x416   : > { %s2942_s24 = smov %s2280_s27  ;;  %22 = sbr.rel (!%p20_p13) target bundleno = 6 (0x6), region = 93 }
 0x41a   : > { %s2941_s23 = smov %s2938_s11 }
 0x41d   :  { %1812 = vsyncpa [#allocation3], 1 }
 0x41e   :  { %1814 = vsyncpa [#allocation3 + $0x1], 1 }
 0x41f   :  { %1815 = vsyncpa [#allocation6], 1 }
 0x420   :  { %1816 = vsyncpa [#allocation4], 1 }
 0x421   :  { %1818 = vsyncpa [#allocation4 + $0x1], 1 }

</bundles_post_ra>
